<compile_context>
chip_gen: v7x
topology: tpu7x:2x2x1
jax: 0.10.0
libtpu: 0.0.40
codegen_flags: <defaults>
</compile_context>

<pallas_src>
import functools

import jax
import jax.numpy as jnp
from jax.experimental import pallas as pl
from jax.experimental.pallas import tpu as pltpu


def _sacat_kernel(x_ref, f_ref, w1x_ref, w1f_ref, w2_ref, o_ref):
    """Per-pixel channel MLP on a (channels, spatial) tile.

    x_ref, f_ref : (Cin,  TILE_HW)   channels on sublanes, spatial on lanes
    w1x_ref      : (Cout, Cin)       first 1x1 conv, x-half of the concat (f32)
    w1f_ref      : (Cout, Cin)       first 1x1 conv, feature-half (f32)
    w2_ref       : (Cout, Cout)      second 1x1 conv (f32)
    o_ref        : (Cout, TILE_HW)
    """
    x = x_ref[...].astype(jnp.float32)
    f = f_ref[...].astype(jnp.float32)

    # concat([x, f], C) contracted with W1  ==  W1x @ x + W1f @ f
    h = jnp.dot(w1x_ref[...], x, preferred_element_type=jnp.float32)
    h = h + jnp.dot(w1f_ref[...], f, preferred_element_type=jnp.float32)
    h = jnp.maximum(h, 0.0)                                    # ReLU
    h = jnp.dot(w2_ref[...], h, preferred_element_type=jnp.float32)
    o_ref[...] = jax.nn.sigmoid(h).astype(o_ref.dtype)         # Sigmoid


@functools.partial(jax.jit, static_argnames=("max_tile_hw",))
def sacat_forward(x, feature, w1, w2, *, max_tile_hw=16384):
    """x, feature: (N, Cin, H, W). w1: (Cout, 2*Cin, 1, 1). w2: (Cout, Cout, 1, 1)."""
    n, c_in, h, w = x.shape
    c_out = w1.shape[0]
    hw = h * w
    itemsize = jnp.dtype(x.dtype).itemsize

    # Free reshapes (no data movement): NCHW -> (N, C, H*W).
    x_r = x.reshape(n, c_in, hw)
    f_r = feature.reshape(n, c_in, hw)

    # 1x1 conv weights -> plain f32 matrices (cast once, stay VMEM-resident);
    # split W1 over the two concat halves.
    w1_mat = w1[:, :, 0, 0].astype(jnp.float32)    # (Cout, 2*Cin)
    w1x = w1_mat[:, :c_in]                         # (Cout, Cin)   (acts on x)
    w1f = w1_mat[:, c_in:]                         # (Cout, Cin)   (acts on feature)
    w2_mat = w2[:, :, 0, 0].astype(jnp.float32)    # (Cout, Cout)

    # Lane tiling: 128-aligned, as large as the VMEM budget allows so the
    # ~0.35us/step pipeline overhead is amortized; never larger than the
    # (aligned) spatial extent. Pad the tail instead of requiring divisibility.
    tile_budget_bytes = 16 * 1024 * 1024           # double-buffered in+out tiles
    bytes_per_lane = (2 * c_in + c_out) * itemsize * 2     # x, f, out; x2 buffers
    max_tile_from_vmem = max(128, (tile_budget_bytes // bytes_per_lane) // 128 * 128)
    hw_aligned = pl.cdiv(hw, 128) * 128
    tile = max(128, min(pl.cdiv(max_tile_hw, 128) * 128,
                        max_tile_from_vmem,
                        hw_aligned))
    hw_pad = pl.cdiv(hw, tile) * tile
    if hw_pad != hw:
        pad = ((0, 0), (0, 0), (0, hw_pad - hw))
        x_r = jnp.pad(x_r, pad)
        f_r = jnp.pad(f_r, pad)

    grid = (n, hw_pad // tile)

    # VMEM limit from the actual per-step footprint (tiles double-buffered by
    # the pipeline) plus the resident weights, with generous headroom but kept
    # well under v7x's 64 MiB physical VMEM.
    per_step_bytes = tile * (2 * c_in + c_out) * itemsize * 2
    weight_bytes = (2 * c_out * c_in + c_out * c_out) * 4
    vmem_limit = int(min(40 * 1024 * 1024,
                         max(4 * 1024 * 1024,
                             2 * (per_step_bytes + weight_bytes))))

    out = pl.pallas_call(
        _sacat_kernel,
        out_shape=jax.ShapeDtypeStruct((n, c_out, hw_pad), x.dtype),
        grid_spec=pltpu.PrefetchScalarGridSpec(
            num_scalar_prefetch=0,
            grid=grid,
            in_specs=[
                pl.BlockSpec((None, c_in, tile), lambda b, j: (b, 0, j)),
                pl.BlockSpec((None, c_in, tile), lambda b, j: (b, 0, j)),
                pl.BlockSpec((c_out, c_in), lambda b, j: (0, 0)),   # resident
                pl.BlockSpec((c_out, c_in), lambda b, j: (0, 0)),   # resident
                pl.BlockSpec((c_out, c_out), lambda b, j: (0, 0)),  # resident
            ],
            out_specs=pl.BlockSpec((None, c_out, tile), lambda b, j: (b, 0, j)),
        ),
        compiler_params=pltpu.CompilerParams(
            dimension_semantics=("parallel", "parallel"),
            vmem_limit_bytes=vmem_limit,
        ),
    )(x_r, f_r, w1x, w1f, w2_mat)

    if hw_pad != hw:
        out = out[:, :, :hw]
    return out.reshape(n, c_out, h, w)


def sacat_reference(x, feature, w1, w2):
    """Plain-JAX reference of the PyTorch forward (for sanity check)."""
    hcat = jnp.concatenate([x, feature], axis=1)                 # (N, 2Cin, H, W)
    h1 = jnp.einsum("nchw,oc->nohw", hcat, w1[:, :, 0, 0])
    h1 = jnp.maximum(h1, 0.0)
    h2 = jnp.einsum("nchw,oc->nohw", h1, w2[:, :, 0, 0])
    return jax.nn.sigmoid(h2)


if __name__ == "__main__":
    key = jax.random.PRNGKey(0)
    k_x, k_f, k_w1, k_w2 = jax.random.split(key, 4)

    n, c_in, c_out, hw = 2, 4, 4, 16

    x = jax.random.normal(k_x, (n, c_in, hw, hw), dtype=jnp.float32)
    feature = jax.random.normal(k_f, (n, c_in, hw, hw), dtype=jnp.float32)

    # Synthetic weights matching nn.Conv2d(in*2, out, 1, bias=False) shapes.
    w1 = jax.random.normal(k_w1, (c_out, 2 * c_in, 1, 1), dtype=jnp.float32) * 0.1
    w2 = jax.random.normal(k_w2, (c_out, c_out, 1, 1), dtype=jnp.float32) * 0.1

    out = sacat_forward(x, feature, w1, w2)
    out = jax.block_until_ready(out)

    ref = sacat_reference(x, feature, w1, w2)
    assert out.shape == (n, c_out, hw, hw)
    assert jnp.allclose(out, ref, atol=1e-5, rtol=1e-5)

    print("KERNEL_OK")
</pallas_src>

<mosaic_0001>
module attributes {stable_mosaic.version = 11 : i64} {
  func.func @_sacat_kernel(%arg0: i32, %arg1: i32, %arg2: memref<1x4x256xf32, #tpu.memory_space<vmem>>, %arg3: memref<1x4x256xf32, #tpu.memory_space<vmem>>, %arg4: memref<4x4xf32, #tpu.memory_space<vmem>>, %arg5: memref<4x4xf32, #tpu.memory_space<vmem>>, %arg6: memref<4x4xf32, #tpu.memory_space<vmem>>, %arg7: memref<1x4x256xf32, #tpu.memory_space<vmem>>) attributes {dimension_semantics = [#tpu.dimension_semantics<parallel>, #tpu.dimension_semantics<parallel>], iteration_bounds = array<i64: 2, 1>, scalar_prefetch = 0 : i64, scratch_operands = 0 : i64, tpu.core_type = #tpu.core_type<tc>, window_params = [{transform_indices = @transform_0, window_bounds = array<i64: 1, 4, 256>}, {transform_indices = @transform_1, window_bounds = array<i64: 1, 4, 256>}, {pipeline_mode = #tpu.pipeline_mode<synchronous>, transform_indices = @transform_2, window_bounds = array<i64: 4, 4>}, {pipeline_mode = #tpu.pipeline_mode<synchronous>, transform_indices = @transform_3, window_bounds = array<i64: 4, 4>}, {pipeline_mode = #tpu.pipeline_mode<synchronous>, transform_indices = @transform_4, window_bounds = array<i64: 4, 4>}, {transform_indices = @transform_5, window_bounds = array<i64: 1, 4, 256>}]} {
    %c0 = arith.constant 0 : index
    %c0_0 = arith.constant 0 : index
    %c0_1 = arith.constant 0 : index
    %0 = vector.load %arg2[%c0, %c0_0, %c0_1] : memref<1x4x256xf32, #tpu.memory_space<vmem>>, vector<1x4x256xf32>
    %1 = vector.shape_cast %0 : vector<1x4x256xf32> to vector<4x256xf32>
    %c0_2 = arith.constant 0 : index
    %c0_3 = arith.constant 0 : index
    %c0_4 = arith.constant 0 : index
    %2 = vector.load %arg3[%c0_2, %c0_3, %c0_4] : memref<1x4x256xf32, #tpu.memory_space<vmem>>, vector<1x4x256xf32>
    %3 = vector.shape_cast %2 : vector<1x4x256xf32> to vector<4x256xf32>
    %c0_5 = arith.constant 0 : index
    %c0_6 = arith.constant 0 : index
    %4 = vector.load %arg4[%c0_5, %c0_6] : memref<4x4xf32, #tpu.memory_space<vmem>>, vector<4x4xf32>
    %cst = arith.constant dense<0.000000e+00> : vector<4x256xf32>
    %5 = tpu.matmul %4, %1, %cst {dimension_numbers = #tpu.dot_dimension_numbers<[1], [0], [0], [1], [0, 0, 1, 1], [], []>} : vector<4x4xf32>, vector<4x256xf32>, vector<4x256xf32> -> vector<4x256xf32>
    %c0_7 = arith.constant 0 : index
    %c0_8 = arith.constant 0 : index
    %6 = vector.load %arg5[%c0_7, %c0_8] : memref<4x4xf32, #tpu.memory_space<vmem>>, vector<4x4xf32>
    %cst_9 = arith.constant dense<0.000000e+00> : vector<4x256xf32>
    %7 = tpu.matmul %6, %3, %cst_9 {dimension_numbers = #tpu.dot_dimension_numbers<[1], [0], [0], [1], [0, 0, 1, 1], [], []>} : vector<4x4xf32>, vector<4x256xf32>, vector<4x256xf32> -> vector<4x256xf32>
    %8 = arith.addf %5, %7 : vector<4x256xf32>
    %cst_10 = arith.constant 0.000000e+00 : f32
    %9 = vector.broadcast %cst_10 : f32 to vector<4x256xf32>
    %10 = arith.maximumf %8, %9 : vector<4x256xf32>
    %c0_11 = arith.constant 0 : index
    %c0_12 = arith.constant 0 : index
    %11 = vector.load %arg6[%c0_11, %c0_12] : memref<4x4xf32, #tpu.memory_space<vmem>>, vector<4x4xf32>
    %cst_13 = arith.constant dense<0.000000e+00> : vector<4x256xf32>
    %12 = tpu.matmul %11, %10, %cst_13 {dimension_numbers = #tpu.dot_dimension_numbers<[1], [0], [0], [1], [0, 0, 1, 1], [], []>} : vector<4x4xf32>, vector<4x256xf32>, vector<4x256xf32> -> vector<4x256xf32>
    %13 = arith.negf %12 : vector<4x256xf32>
    %14 = math.exp %13 : vector<4x256xf32>
    %cst_14 = arith.constant 1.000000e+00 : f32
    %15 = vector.broadcast %cst_14 : f32 to vector<4x256xf32>
    %16 = arith.addf %15, %14 : vector<4x256xf32>
    %17 = arith.divf %15, %16 : vector<4x256xf32>
    %c0_15 = arith.constant 0 : index
    %c0_16 = arith.constant 0 : index
    %c0_17 = arith.constant 0 : index
    %18 = vector.load %arg7[%c0_15, %c0_16, %c0_17] : memref<1x4x256xf32, #tpu.memory_space<vmem>>, vector<1x4x256xf32>
    %19 = vector.shape_cast %18 : vector<1x4x256xf32> to vector<4x256xf32>
    %20 = vector.shape_cast %17 : vector<4x256xf32> to vector<1x4x256xf32>
    tpu.vector_store %arg7[%c0_15, %c0_16, %c0_17], %20 {strides = array<i32>} : memref<1x4x256xf32, #tpu.memory_space<vmem>>, vector<1x4x256xf32>,
    return
  }
  func.func @transform_0(%arg0: i32, %arg1: i32) -> (i32, i32, i32) {
    %c0_i32 = arith.constant 0 : i32
    %c0_i32_0 = arith.constant 0 : i32
    return %arg0, %c0_i32, %arg1 : i32, i32, i32
  }
  func.func @transform_1(%arg0: i32, %arg1: i32) -> (i32, i32, i32) {
    %c0_i32 = arith.constant 0 : i32
    %c0_i32_0 = arith.constant 0 : i32
    return %arg0, %c0_i32, %arg1 : i32, i32, i32
  }
  func.func @transform_2(%arg0: i32, %arg1: i32) -> (i32, i32) {
    %c0_i32 = arith.constant 0 : i32
    %c0_i32_0 = arith.constant 0 : i32
    %c0_i32_1 = arith.constant 0 : i32
    return %c0_i32, %c0_i32_0 : i32, i32
  }
  func.func @transform_3(%arg0: i32, %arg1: i32) -> (i32, i32) {
    %c0_i32 = arith.constant 0 : i32
    %c0_i32_0 = arith.constant 0 : i32
    %c0_i32_1 = arith.constant 0 : i32
    return %c0_i32, %c0_i32_0 : i32, i32
  }
  func.func @transform_4(%arg0: i32, %arg1: i32) -> (i32, i32) {
    %c0_i32 = arith.constant 0 : i32
    %c0_i32_0 = arith.constant 0 : i32
    %c0_i32_1 = arith.constant 0 : i32
    return %c0_i32, %c0_i32_0 : i32, i32
  }
  func.func @transform_5(%arg0: i32, %arg1: i32) -> (i32, i32, i32) {
    %c0_i32 = arith.constant 0 : i32
    %c0_i32_0 = arith.constant 0 : i32
    return %arg0, %c0_i32, %arg1 : i32, i32, i32
  }
}

</mosaic_0001>

<bundles_post_ra>
// kernel: sacat_forward.1
= control target key start
LH: loop header
LB: loop body
LE: loop exit
PB: predicated region body
PF: predicated region fallthrough
CT: control target
= control target key end

     0   :  { %s790_s18 = smov 0   ;;  %s792_s19 = smov 0   ;;  %s849_s0 = inlined_call_operand.vmem [shape: f32[2,4,256], index: 0, kind: input, shape index: {}]   ;;  %s850_s1 = inlined_call_operand.vmem [shape: f32[2,4,256], index: 1, kind: input, shape index: {}]   ;;  %s851_s2 = inlined_call_operand.vmem [shape: f32[4,4], index: 2, kind: input, shape index: {}]   ;;  %s852_s3 = inlined_call_operand.vmem [shape: f32[4,4], index: 3, kind: input, shape index: {}]   ;;  %s853_s4 = inlined_call_operand.vmem [shape: f32[4,4], index: 4, kind: input, shape index: {}]   ;;  %s854_s5 = inlined_call_operand.vmem [shape: f32[2,4,256], index: 5, kind: output, shape index: {}]  }
   0x1   :  { %s794_s20 = smov 0  }
   0x2 LB: > { %s27_s21 = sadd.s32 1, %s753_s19  ;;  %p675_p0 = scmp.ge.s32.totalorder %s757_s20, 1  ;;  %s757_s20 = sphi %s794_s20, %s15_s20   ;;  %s753_s19 = sphi %s792_s19, %s856_s19   ;;  %s749_s18 = sphi %s790_s18, %s855_s18  }
   0x3   : > { %p29_p1 = scmp.ge.s32.totalorder %s27_s21, 2  ;;  %p225_p2 = scmp.lt.s32.totalorder %s757_s20, 3 }
   0x5   : > { %s858_s21 = smov (%p29_p1, %s27_s21), 0  ;;  %p226_p3 = pnand %p675_p0, %p225_p2 }
   0x6   : > { %p271_p4 = scmp.lt.s32.totalorder (!%p226_p3), %s749_s18, 1  ;;  %v759_v0 = vmov (!%p226_p3), 0.0   ;;  %vm310_vm0 = vcmask (!%p226_p3), 1043456   ;;  %v303_v5 = vld [vmem:[%s852_s3] sm:$0xf] (!%p226_p3)  ;;  %vm306_vm1 = vcmask (!%p226_p3), 31744  }
   0x7   : > { %229 = sbr.rel (%p226_p3) target bundleno = 490 (0x1ea), region = 40  ;;  %379 = vmatprep.mubr.f32.mxu0 (!%p226_p3), %v759_v0  ;;  %542 = vmatprep.mubr.f32.mxu1 (!%p226_p3), %v759_v0  ;;  %v302_v6 = vld [vmem:[%s851_s2] sm:$0xf] (!%p226_p3) }
   0x8   : > { %v468_v11 = vld [vmem:[%s853_s4] sm:$0xf] (!%p226_p3) }
   0xe   : > { %s860_s18 = smov (!%p271_p4, %s749_s18), 1 }
   0xf   : > { %s808_s22 = sshll.u32 %s860_s18, 3 }
  0x10   : > { %s278_s25 = scalar_lea.vmem %s849_s0, %s808_s22  ;;  %s288_s28 = scalar_lea.vmem %s850_s1, %s808_s22 }
  0x11   : > { %v300_v1 = vld [vmem:[%s278_s25] sm:$0xff]  ;;  %s298_s12 = scalar_lea.vmem %s854_s5, %s808_s22 }
  0x12   : > { %v301_v2 = vld [vmem:[%s288_s28] sm:$0xff]  ;;  %v387_v4 = vcombine.high %v300_v1, %v300_v1 }
  0x13   : > { %v305_v3 = vcombine.high %v301_v2, %v301_v2 }
  0x15   : > { %682 = vmatprep.subr.msk.mxu0 %vm310_vm0, %v305_v3 }
  0x16   : > { %683 = vmatpush1.msk.msra.mxu0 %vm310_vm0, %v301_v2 }
  0x17   : > { %684 = vmatmul.mubr.msk.f32.vlgmr.msra.gmra.mrb[0].mxu0 %vm306_vm1, %v303_v5  ;;  %685 = vmatprep.subr.msk.mxu0 %vm310_vm0, %v387_v4 }
  0x18   : > { %686 = vmatpush1.msk.msra.mxu0 %vm310_vm0, %v300_v1  ;;  %459 = vmatprep.mubr.f32.mxu0 %v759_v0 }
  0x1f   : > { %687 = vmatmul.mubr.msk.f32.vlgmr.msra.gmra.mrb[0].mxu0 %vm306_vm1, %v302_v6 }
  0xf2   : > { %v461_v7 = vpop.f32.mrb[0].mxu0 }
  0xf3   : > { %v463_v8 = vpop.f32.mrb[1].mxu0  ;;  %v466_v10 = vmax.f32 %v461_v7, 0.0 }
  0xf4   : > { %v467_v9 = vmax.f32 %v463_v8, 0.0 }
  0xf6   : > { %688 = vmatprep.subr.msk.mxu1 %vm310_vm0, %v467_v9 }
  0xf7   : > { %689 = vmatpush1.msk.msra.mxu1 %vm310_vm0, %v466_v10 }
  0xf8   : > { %690 = vmatmul.mubr.msk.f32.vlgmr.msra.gmra.mrb[0].mxu1 %vm306_vm1, %v468_v11 }
 0x1cb   : > { %v544_v12 = vpop.f32.mrb[0].mxu1 }
 0x1cc   : > { %v691_v13 = vmul.f32 -1.442695, %v544_v12  ;;  %v546_v14 = vpop.f32.mrb[1].mxu1 }
 0x1cd   : > { %v692_v15 = vmul.f32 -1.442695, %v546_v14 }
 0x1ce   : > { %727 = vpow2.f32 %v691_v13 }
 0x1cf   : > { %729 = vpow2.f32 %v692_v15 }
 0x1d8   : > { %v728_v16 = vpop.eup %727 }
 0x1d9   : > { %v730_v17 = vpop.eup %729  ;;  %v555_v18 = vadd.f32 1.0, %v728_v16 }
 0x1da   : > { %v556_v19 = vadd.f32 1.0, %v730_v17 }
 0x1db   : > { %731 = vrcp.f32 %v555_v18 }
 0x1dc   : > { %733 = vrcp.f32 %v556_v19 }
 0x1e5   : > { %v732_v20 = vpop.eup %731 }
 0x1e6   : > { %v734_v21 = vpop.eup %733 }
 0x1e7   : > { %v563_v22 = vcombine.low %v732_v20, %v734_v21 }
 0x1e9   : > { %565 = vst [vmem:[%s298_s12] sm:$0xff] %v563_v22 }
 0x1ea PF: > { %s15_s20 = sadd.s32 1, %s757_s20   ;;  %s855_s18 = smov %s753_s19 }
 0x1eb   : > { %p12_p5 = scmp.ge.s32.totalorder %s15_s20, 4   ;;  %s856_s19 = smov %s858_s21 }
 0x1ed   :  { %14 = sbr.rel (!%p12_p5) target bundleno = 2 (0x2), region = 73 }

</bundles_post_ra>
